<compile_context>
chip_gen: v7x
topology: tpu7x:2x2x1
jax: 0.10.0
libtpu: 0.0.40
codegen_flags: <defaults>
</compile_context>

<pallas_src>
import functools

import jax
import jax.numpy as jnp
from jax.experimental import pallas as pl
from jax.experimental.pallas import tpu as pltpu

BN_EPS = 1e-5


def _prediction_mlp_kernel(x_ref, w1_ref, gamma_ref, beta_ref, w2_ref, b2_ref,
                           o_ref,
                           h_ref, sum_ref, sq_ref, scale_ref, shift_ref,
                           *, block_n, n_total, eps):
    p = pl.program_id(0)   # 0 = layer-1 + stats pass, 1 = BN-apply + layer-2 pass
    i = pl.program_id(1)   # batch-tile index
    row0 = pl.multiple_of(i * block_n, block_n)   # aligned row offset into h cache

    @pl.when(p == 0)
    def _pass0():
        @pl.when(i == 0)
        def _init_stats():
            sum_ref[...] = jnp.zeros_like(sum_ref)
            sq_ref[...] = jnp.zeros_like(sq_ref)

        # layer1 matmul: in-kernel f32->bf16 cast of the x tile (VPU work, hidden
        # under the MXU), f32 accumulation.  Computed exactly once per tile and
        # cached in VMEM so pass 1 never re-runs it (removes ~1/3 of MXU FLOPs).
        h = jnp.dot(x_ref[...].astype(jnp.bfloat16), w1_ref[...],
                    preferred_element_type=jnp.float32)
        h_ref[pl.ds(row0, block_n), :] = h
        sum_ref[...] += jnp.sum(h, axis=0, keepdims=True)
        sq_ref[...] += jnp.sum(h * h, axis=0, keepdims=True)

    @pl.when(p == 1)
    def _pass1():
        @pl.when(i == 0)
        def _finalize_stats():
            inv_n = jnp.float32(1.0 / n_total)
            mean = sum_ref[...] * inv_n
            # Clamp: E[h^2] - E[h]^2 can go slightly negative in f32 (avoids NaN
            # through rsqrt when mean dominates std).  Biased var = train-mode BN.
            var = jnp.maximum(sq_ref[...] * inv_n - mean * mean, 0.0)
            scale = gamma_ref[...] * jax.lax.rsqrt(var + eps)
            scale_ref[...] = scale
            shift_ref[...] = beta_ref[...] - mean * scale

        h = h_ref[pl.ds(row0, block_n), :]                            # cached f32 h
        hn = jnp.maximum(h * scale_ref[...] + shift_ref[...], 0.0)    # fused BN + ReLU
        o_ref[...] = (jnp.dot(hn.astype(w2_ref.dtype), w2_ref[...],
                              preferred_element_type=jnp.float32)
                      + b2_ref[...]).astype(o_ref.dtype)


def prediction_mlp(x, w1, gamma, beta, w2, b2, *, block_n=512,
                   vmem_limit_bytes=48 * 1024 * 1024):
    """Forward pass of prediction_MLP (train-mode BatchNorm, batch statistics).

    x:  (N, in_dim) float32 (cast to bf16 inside the kernel, tile by tile)
    w1: (in_dim, hidden)   pre-transposed layer-1 weight (bias dropped: BN cancels it)
    gamma, beta: (1, hidden) BatchNorm affine params
    w2: (hidden, out_dim)  pre-transposed layer-2 weight
    b2: (1, out_dim)       layer-2 bias
    Returns (N, out_dim) float32.
    """
    n, in_dim = x.shape
    hidden = w1.shape[1]
    out_dim = w2.shape[1]
    block_n = min(block_n, n)
    assert n % block_n == 0, "batch must be divisible by block_n"

    # Weights pre-cast to bf16 outside (cheap, one-time); all stats math stays f32.
    w1_16 = w1.astype(jnp.bfloat16)
    w2_16 = w2.astype(jnp.bfloat16)
    gamma = gamma.reshape(1, hidden).astype(jnp.float32)
    beta = beta.reshape(1, hidden).astype(jnp.float32)
    b2 = b2.reshape(1, out_dim).astype(jnp.float32)

    kernel = functools.partial(_prediction_mlp_kernel,
                               block_n=block_n, n_total=n, eps=BN_EPS)

    const = lambda p, i: (0, 0)            # resident blocks (weights, BN params, bias)
    resident = dict(pipeline_mode=pl.Buffered(1))   # never re-fetched -> single buffer

    return pl.pallas_call(
        kernel,
        out_shape=jax.ShapeDtypeStruct((n, out_dim), jnp.float32),
        grid_spec=pltpu.PrefetchScalarGridSpec(
            num_scalar_prefetch=0,
            grid=(2, n // block_n),
            in_specs=[
                # x: walks batch tiles in pass 0; pinned to block 0 in pass 1 so no
                # second-pass x DMA is issued.
                pl.BlockSpec((block_n, in_dim), lambda p, i: (i * (1 - p), 0)),
                pl.BlockSpec((in_dim, hidden), const, **resident),    # w1
                pl.BlockSpec((1, hidden), const, **resident),         # gamma
                pl.BlockSpec((1, hidden), const, **resident),         # beta
                pl.BlockSpec((hidden, out_dim), const, **resident),   # w2
                pl.BlockSpec((1, out_dim), const, **resident),        # b2
            ],
            # (i * p, 0): pinned to block 0 during the stats pass (no wasted
            # write-backs), then walks the batch tiles during the output pass.
            out_specs=pl.BlockSpec((block_n, out_dim), lambda p, i: (i * p, 0)),
            scratch_shapes=[
                pltpu.VMEM((n, hidden), jnp.float32),   # cached layer-1 activations
                pltpu.VMEM((1, hidden), jnp.float32),   # sum(h)
                pltpu.VMEM((1, hidden), jnp.float32),   # sum(h^2)
                pltpu.VMEM((1, hidden), jnp.float32),   # BN scale
                pltpu.VMEM((1, hidden), jnp.float32),   # BN shift
            ],
        ),
        compiler_params=pltpu.CompilerParams(
            # Both axes carry the BN reduction / pass ordering -> "arbitrary".
            dimension_semantics=("arbitrary", "arbitrary"),
            vmem_limit_bytes=vmem_limit_bytes,
        ),
    )(x, w1_16, gamma, beta, w2_16, b2)


def _reference(x, w1, b1, gamma, beta, w2, b2):
    """Textbook forward of the PyTorch module (train-mode BN), with the same
    bf16 weight precision as the kernel.  b1 is included here to demonstrate
    that dropping it in the kernel is semantics-preserving (BN cancels it)."""
    xb = x.astype(jnp.bfloat16)
    h = jnp.dot(xb, w1.astype(jnp.bfloat16), preferred_element_type=jnp.float32) + b1
    mean = jnp.mean(h, axis=0, keepdims=True)
    var = jnp.mean((h - mean) ** 2, axis=0, keepdims=True)
    h = (h - mean) / jnp.sqrt(var + BN_EPS)
    h = h * gamma + beta
    h = jnp.maximum(h, 0.0)
    return (jnp.dot(h.astype(jnp.bfloat16), w2.astype(jnp.bfloat16),
                    preferred_element_type=jnp.float32) + b2)


if __name__ == "__main__":
    # Small, lane-aligned shapes consistent with the module
    # (real SimSiam predictor: in_dim=out_dim=2048, hidden=512, batch ~4096).
    N, IN_DIM, HIDDEN, OUT_DIM = 256, 256, 128, 256

    key = jax.random.PRNGKey(0)
    kx, kw1, kb1, kw2, kb2 = jax.random.split(key, 5)

    x = jax.random.normal(kx, (N, IN_DIM), dtype=jnp.float32)

    w1 = jax.random.normal(kw1, (IN_DIM, HIDDEN), dtype=jnp.float32) * 0.02
    b1 = jax.random.normal(kb1, (1, HIDDEN), dtype=jnp.float32) * 0.02   # reference-only
    gamma = jnp.ones((1, HIDDEN), dtype=jnp.float32)
    beta = jnp.zeros((1, HIDDEN), dtype=jnp.float32)
    w2 = jax.random.normal(kw2, (HIDDEN, OUT_DIM), dtype=jnp.float32) * 0.02
    b2 = jax.random.normal(kb2, (1, OUT_DIM), dtype=jnp.float32) * 0.02

    # Small demo uses block_n=128 (2 batch tiles) to exercise the multi-tile path.
    out = prediction_mlp(x, w1, gamma, beta, w2, b2, block_n=128)
    out = jax.block_until_ready(out)

    ref = _reference(x, w1, b1, gamma, beta, w2, b2)
    assert out.shape == (N, OUT_DIM)
    assert jnp.allclose(out, ref, atol=2e-3, rtol=2e-3), float(jnp.max(jnp.abs(out - ref)))

    print("KERNEL_OK")
</pallas_src>

<mosaic_0001>
module attributes {stable_mosaic.version = 11 : i64} {
  func.func @_prediction_mlp_kernel(%arg0: i32, %arg1: i32, %arg2: memref<128x256xf32, #tpu.memory_space<vmem>>, %arg3: memref<256x128xbf16, #tpu.memory_space<vmem>>, %arg4: memref<1x128xf32, #tpu.memory_space<vmem>>, %arg5: memref<1x128xf32, #tpu.memory_space<vmem>>, %arg6: memref<128x256xbf16, #tpu.memory_space<vmem>>, %arg7: memref<1x256xf32, #tpu.memory_space<vmem>>, %arg8: memref<128x256xf32, #tpu.memory_space<vmem>>, %arg9: memref<256x128xf32, #tpu.memory_space<vmem>>, %arg10: memref<1x128xf32, #tpu.memory_space<vmem>>, %arg11: memref<1x128xf32, #tpu.memory_space<vmem>>, %arg12: memref<1x128xf32, #tpu.memory_space<vmem>>, %arg13: memref<1x128xf32, #tpu.memory_space<vmem>>) attributes {dimension_semantics = [#tpu.dimension_semantics<arbitrary>, #tpu.dimension_semantics<arbitrary>], iteration_bounds = array<i64: 2, 2>, scalar_prefetch = 0 : i64, scratch_operands = 5 : i64, tpu.core_type = #tpu.core_type<tc>, window_params = [{transform_indices = @transform_0, window_bounds = array<i64: 128, 256>}, {pipeline_mode = #tpu.pipeline_mode<synchronous>, transform_indices = @transform_1, window_bounds = array<i64: 256, 128>}, {pipeline_mode = #tpu.pipeline_mode<synchronous>, transform_indices = @transform_2, window_bounds = array<i64: 1, 128>}, {pipeline_mode = #tpu.pipeline_mode<synchronous>, transform_indices = @transform_3, window_bounds = array<i64: 1, 128>}, {pipeline_mode = #tpu.pipeline_mode<synchronous>, transform_indices = @transform_4, window_bounds = array<i64: 128, 256>}, {pipeline_mode = #tpu.pipeline_mode<synchronous>, transform_indices = @transform_5, window_bounds = array<i64: 1, 256>}, {transform_indices = @transform_6, window_bounds = array<i64: 128, 256>}]} {
    %c128_i32 = arith.constant 128 : i32
    %0 = arith.muli %arg1, %c128_i32 : i32
    %1 = tpu.assume_multiple %0, 128 : i32
    %c0_i32 = arith.constant 0 : i32
    %2 = arith.cmpi eq, %arg0, %c0_i32 : i32
    %3 = arith.extui %2 : i1 to i32
    %c0_i32_0 = arith.constant 0 : i32
    %4 = arith.cmpi ne, %3, %c0_i32_0 : i32
    scf.if %4 {
      %c0_i32_2 = arith.constant 0 : i32
      %8 = arith.cmpi eq, %arg1, %c0_i32_2 : i32
      %9 = arith.extui %8 : i1 to i32
      %c0_i32_3 = arith.constant 0 : i32
      %10 = arith.cmpi ne, %9, %c0_i32_3 : i32
      scf.if %10 {
        %cst_18 = arith.constant 0.000000e+00 : f32
        %28 = vector.broadcast %cst_18 : f32 to vector<1x128xf32>
        %c0_19 = arith.constant 0 : index
        %c0_20 = arith.constant 0 : index
        %29 = vector.load %arg10[%c0_19, %c0_20] : memref<1x128xf32, #tpu.memory_space<vmem>>, vector<1x128xf32>
        tpu.vector_store %arg10[%c0_19, %c0_20], %28 {strides = array<i32>} : memref<1x128xf32, #tpu.memory_space<vmem>>, vector<1x128xf32>,
        %cst_21 = arith.constant 0.000000e+00 : f32
        %30 = vector.broadcast %cst_21 : f32 to vector<1x128xf32>
        %c0_22 = arith.constant 0 : index
        %c0_23 = arith.constant 0 : index
        %31 = vector.load %arg11[%c0_22, %c0_23] : memref<1x128xf32, #tpu.memory_space<vmem>>, vector<1x128xf32>
        tpu.vector_store %arg11[%c0_22, %c0_23], %30 {strides = array<i32>} : memref<1x128xf32, #tpu.memory_space<vmem>>, vector<1x128xf32>,
      } else {
      }
      %c0 = arith.constant 0 : index
      %c0_4 = arith.constant 0 : index
      %11 = vector.load %arg2[%c0, %c0_4] : memref<128x256xf32, #tpu.memory_space<vmem>>, vector<128x256xf32>
      %12 = arith.truncf %11 : vector<128x256xf32> to vector<128x256xbf16>
      %c0_5 = arith.constant 0 : index
      %c0_6 = arith.constant 0 : index
      %13 = vector.load %arg3[%c0_5, %c0_6] : memref<256x128xbf16, #tpu.memory_space<vmem>>, vector<256x128xbf16>
      %cst = arith.constant dense<0.000000e+00> : vector<128x128xf32>
      %14 = tpu.matmul %12, %13, %cst {dimension_numbers = #tpu.dot_dimension_numbers<[1], [0], [0], [1], [0, 0, 1, 1], [], []>} : vector<128x256xbf16>, vector<256x128xbf16>, vector<128x128xf32> -> vector<128x128xf32>
      %15 = arith.index_cast %1 : i32 to index
      %c0_7 = arith.constant 0 : index
      %16 = vector.load %arg9[%15, %c0_7] : memref<256x128xf32, #tpu.memory_space<vmem>>, vector<128x128xf32>
      tpu.vector_store %arg9[%15, %c0_7], %14 {strides = array<i32>} : memref<256x128xf32, #tpu.memory_space<vmem>>, vector<128x128xf32>,
      %c0_8 = arith.constant 0 : index
      %c0_9 = arith.constant 0 : index
      %17 = vector.load %arg10[%c0_8, %c0_9] : memref<1x128xf32, #tpu.memory_space<vmem>>, vector<1x128xf32>
      %cst_10 = arith.constant dense<0.000000e+00> : vector<128xf32>
      %18 = vector.multi_reduction <add>, %14, %cst_10 [0] : vector<128x128xf32> to vector<128xf32>
      %19 = vector.shape_cast %18 : vector<128xf32> to vector<1x128xf32>
      %20 = arith.addf %17, %19 : vector<1x128xf32>
      %c0_11 = arith.constant 0 : index
      %c0_12 = arith.constant 0 : index
      %21 = vector.load %arg10[%c0_11, %c0_12] : memref<1x128xf32, #tpu.memory_space<vmem>>, vector<1x128xf32>
      tpu.vector_store %arg10[%c0_11, %c0_12], %20 {strides = array<i32>} : memref<1x128xf32, #tpu.memory_space<vmem>>, vector<1x128xf32>,
      %c0_13 = arith.constant 0 : index
      %c0_14 = arith.constant 0 : index
      %22 = vector.load %arg11[%c0_13, %c0_14] : memref<1x128xf32, #tpu.memory_space<vmem>>, vector<1x128xf32>
      %23 = arith.mulf %14, %14 : vector<128x128xf32>
      %cst_15 = arith.constant dense<0.000000e+00> : vector<128xf32>
      %24 = vector.multi_reduction <add>, %23, %cst_15 [0] : vector<128x128xf32> to vector<128xf32>
      %25 = vector.shape_cast %24 : vector<128xf32> to vector<1x128xf32>
      %26 = arith.addf %22, %25 : vector<1x128xf32>
      %c0_16 = arith.constant 0 : index
      %c0_17 = arith.constant 0 : index
      %27 = vector.load %arg11[%c0_16, %c0_17] : memref<1x128xf32, #tpu.memory_space<vmem>>, vector<1x128xf32>
      tpu.vector_store %arg11[%c0_16, %c0_17], %26 {strides = array<i32>} : memref<1x128xf32, #tpu.memory_space<vmem>>, vector<1x128xf32>,
    } else {
    }
    %c1_i32 = arith.constant 1 : i32
    %5 = arith.cmpi eq, %arg0, %c1_i32 : i32
    %6 = arith.extui %5 : i1 to i32
    %c0_i32_1 = arith.constant 0 : i32
    %7 = arith.cmpi ne, %6, %c0_i32_1 : i32
    scf.if %7 {
      %c0_i32_2 = arith.constant 0 : i32
      %8 = arith.cmpi eq, %arg1, %c0_i32_2 : i32
      %9 = arith.extui %8 : i1 to i32
      %c0_i32_3 = arith.constant 0 : i32
      %10 = arith.cmpi ne, %9, %c0_i32_3 : i32
      scf.if %10 {
        %c0_15 = arith.constant 0 : index
        %c0_16 = arith.constant 0 : index
        %28 = vector.load %arg10[%c0_15, %c0_16] : memref<1x128xf32, #tpu.memory_space<vmem>>, vector<1x128xf32>
        %cst_17 = arith.constant 3.906250e-03 : f32
        %29 = vector.broadcast %cst_17 : f32 to vector<1x128xf32>
        %30 = arith.mulf %28, %29 : vector<1x128xf32>
        %c0_18 = arith.constant 0 : index
        %c0_19 = arith.constant 0 : index
        %31 = vector.load %arg11[%c0_18, %c0_19] : memref<1x128xf32, #tpu.memory_space<vmem>>, vector<1x128xf32>
        %cst_20 = arith.constant 3.906250e-03 : f32
        %32 = vector.broadcast %cst_20 : f32 to vector<1x128xf32>
        %33 = arith.mulf %31, %32 : vector<1x128xf32>
        %34 = arith.mulf %30, %30 : vector<1x128xf32>
        %35 = arith.subf %33, %34 : vector<1x128xf32>
        %cst_21 = arith.constant 0.000000e+00 : f32
        %36 = vector.broadcast %cst_21 : f32 to vector<1x128xf32>
        %37 = arith.maximumf %35, %36 : vector<1x128xf32>
        %c0_22 = arith.constant 0 : index
        %c0_23 = arith.constant 0 : index
        %38 = vector.load %arg4[%c0_22, %c0_23] : memref<1x128xf32, #tpu.memory_space<vmem>>, vector<1x128xf32>
        %cst_24 = arith.constant 9.99999974E-6 : f32
        %39 = vector.broadcast %cst_24 : f32 to vector<1x128xf32>
        %40 = arith.addf %37, %39 : vector<1x128xf32>
        %41 = math.rsqrt %40 : vector<1x128xf32>
        %42 = arith.mulf %38, %41 : vector<1x128xf32>
        %c0_25 = arith.constant 0 : index
        %c0_26 = arith.constant 0 : index
        %43 = vector.load %arg12[%c0_25, %c0_26] : memref<1x128xf32, #tpu.memory_space<vmem>>, vector<1x128xf32>
        tpu.vector_store %arg12[%c0_25, %c0_26], %42 {strides = array<i32>} : memref<1x128xf32, #tpu.memory_space<vmem>>, vector<1x128xf32>,
        %c0_27 = arith.constant 0 : index
        %c0_28 = arith.constant 0 : index
        %44 = vector.load %arg5[%c0_27, %c0_28] : memref<1x128xf32, #tpu.memory_space<vmem>>, vector<1x128xf32>
        %45 = arith.mulf %30, %42 : vector<1x128xf32>
        %46 = arith.subf %44, %45 : vector<1x128xf32>
        %c0_29 = arith.constant 0 : index
        %c0_30 = arith.constant 0 : index
        %47 = vector.load %arg13[%c0_29, %c0_30] : memref<1x128xf32, #tpu.memory_space<vmem>>, vector<1x128xf32>
        tpu.vector_store %arg13[%c0_29, %c0_30], %46 {strides = array<i32>} : memref<1x128xf32, #tpu.memory_space<vmem>>, vector<1x128xf32>,
      } else {
      }
      %11 = arith.index_cast %1 : i32 to index
      %c0 = arith.constant 0 : index
      %12 = vector.load %arg9[%11, %c0] : memref<256x128xf32, #tpu.memory_space<vmem>>, vector<128x128xf32>
      %c0_4 = arith.constant 0 : index
      %c0_5 = arith.constant 0 : index
      %13 = vector.load %arg12[%c0_4, %c0_5] : memref<1x128xf32, #tpu.memory_space<vmem>>, vector<1x128xf32>
      %14 = vector.broadcast %13 : vector<1x128xf32> to vector<128x128xf32>
      %15 = arith.mulf %12, %14 : vector<128x128xf32>
      %c0_6 = arith.constant 0 : index
      %c0_7 = arith.constant 0 : index
      %16 = vector.load %arg13[%c0_6, %c0_7] : memref<1x128xf32, #tpu.memory_space<vmem>>, vector<1x128xf32>
      %17 = vector.broadcast %16 : vector<1x128xf32> to vector<128x128xf32>
      %18 = arith.addf %15, %17 : vector<128x128xf32>
      %cst = arith.constant 0.000000e+00 : f32
      %19 = vector.broadcast %cst : f32 to vector<128x128xf32>
      %20 = arith.maximumf %18, %19 : vector<128x128xf32>
      %21 = arith.truncf %20 : vector<128x128xf32> to vector<128x128xbf16>
      %c0_8 = arith.constant 0 : index
      %c0_9 = arith.constant 0 : index
      %22 = vector.load %arg6[%c0_8, %c0_9] : memref<128x256xbf16, #tpu.memory_space<vmem>>, vector<128x256xbf16>
      %cst_10 = arith.constant dense<0.000000e+00> : vector<128x256xf32>
      %23 = tpu.matmul %21, %22, %cst_10 {dimension_numbers = #tpu.dot_dimension_numbers<[1], [0], [0], [1], [0, 0, 1, 1], [], []>} : vector<128x128xbf16>, vector<128x256xbf16>, vector<128x256xf32> -> vector<128x256xf32>
      %c0_11 = arith.constant 0 : index
      %c0_12 = arith.constant 0 : index
      %24 = vector.load %arg7[%c0_11, %c0_12] : memref<1x256xf32, #tpu.memory_space<vmem>>, vector<1x256xf32>
      %25 = vector.broadcast %24 : vector<1x256xf32> to vector<128x256xf32>
      %26 = arith.addf %23, %25 : vector<128x256xf32>
      %c0_13 = arith.constant 0 : index
      %c0_14 = arith.constant 0 : index
      %27 = vector.load %arg8[%c0_13, %c0_14] : memref<128x256xf32, #tpu.memory_space<vmem>>, vector<128x256xf32>
      tpu.vector_store %arg8[%c0_13, %c0_14], %26 {strides = array<i32>} : memref<128x256xf32, #tpu.memory_space<vmem>>, vector<128x256xf32>,
    } else {
    }
    return
  }
  func.func @transform_0(%arg0: i32, %arg1: i32) -> (i32, i32) {
    %c1_i32 = arith.constant 1 : i32
    %0 = arith.subi %c1_i32, %arg0 : i32
    %1 = arith.muli %arg1, %0 : i32
    %c0_i32 = arith.constant 0 : i32
    %c0_i32_0 = arith.constant 0 : i32
    return %1, %c0_i32 : i32, i32
  }
  func.func @transform_1(%arg0: i32, %arg1: i32) -> (i32, i32) {
    %c0_i32 = arith.constant 0 : i32
    %c0_i32_0 = arith.constant 0 : i32
    %c0_i32_1 = arith.constant 0 : i32
    return %c0_i32, %c0_i32_0 : i32, i32
  }
  func.func @transform_2(%arg0: i32, %arg1: i32) -> (i32, i32) {
    %c0_i32 = arith.constant 0 : i32
    %c0_i32_0 = arith.constant 0 : i32
    %c0_i32_1 = arith.constant 0 : i32
    return %c0_i32, %c0_i32_0 : i32, i32
  }
  func.func @transform_3(%arg0: i32, %arg1: i32) -> (i32, i32) {
    %c0_i32 = arith.constant 0 : i32
    %c0_i32_0 = arith.constant 0 : i32
    %c0_i32_1 = arith.constant 0 : i32
    return %c0_i32, %c0_i32_0 : i32, i32
  }
  func.func @transform_4(%arg0: i32, %arg1: i32) -> (i32, i32) {
    %c0_i32 = arith.constant 0 : i32
    %c0_i32_0 = arith.constant 0 : i32
    %c0_i32_1 = arith.constant 0 : i32
    return %c0_i32, %c0_i32_0 : i32, i32
  }
  func.func @transform_5(%arg0: i32, %arg1: i32) -> (i32, i32) {
    %c0_i32 = arith.constant 0 : i32
    %c0_i32_0 = arith.constant 0 : i32
    %c0_i32_1 = arith.constant 0 : i32
    return %c0_i32, %c0_i32_0 : i32, i32
  }
  func.func @transform_6(%arg0: i32, %arg1: i32) -> (i32, i32) {
    %0 = arith.muli %arg1, %arg0 : i32
    %c0_i32 = arith.constant 0 : i32
    %c0_i32_0 = arith.constant 0 : i32
    return %0, %c0_i32 : i32, i32
  }
}

</mosaic_0001>

<bundles_post_ra>
// kernel: tpu_custom_call.1
= control target key start
LH: loop header
LB: loop body
LE: loop exit
PB: predicated region body
PF: predicated region fallthrough
CT: control target
= control target key end

     0   :  { %s2301_s0 = inlined_call_operand.hbm [shape: f32[256,256], index: 0, kind: input, shape index: {}]   ;;  %s2302_s1 = inlined_call_operand.hbm [shape: bf16[256,128], index: 1, kind: input, shape index: {}]   ;;  %s2303_s2 = inlined_call_operand.vmem [shape: f32[1,128], index: 2, kind: input, shape index: {}]   ;;  %s2304_s3 = inlined_call_operand.vmem [shape: f32[1,128], index: 3, kind: input, shape index: {}]   ;;  %s2305_s4 = inlined_call_operand.hbm [shape: bf16[128,256], index: 4, kind: input, shape index: {}]   ;;  %s2306_s5 = inlined_call_operand.vmem [shape: f32[1,256], index: 5, kind: input, shape index: {}]   ;;  %s2307_s6 = inlined_call_operand.hbm [shape: f32[256,256], index: 6, kind: output, shape index: {}]  }
   0x1   :  { %2320 = sst [smem:[#allocation22_spill]] %s2302_s1 }
   0x2   :  { %2321 = sst [smem:[#allocation23_spill]] %s2303_s2 }
   0x3   :  { %2322 = sst [smem:[#allocation24_spill]] %s2304_s3 }
   0x4   :  { %2323 = sst [smem:[#allocation25_spill]] %s2305_s4 }
   0x5   :  { %2324 = sst [smem:[#allocation26_spill]] %s2306_s5 }
   0x6   :  { %2325 = sst [smem:[#allocation27_spill]] %s2307_s6 }
   0x7   :  { %11 = vsyncpa [#allocation8], 0 }
   0x8   :  { %13 = vsyncpa [#allocation8 + $0x1], 0 }
   0x9   :  { %14 = vsyncpa [#allocation11], 0 }
   0xa   :  { %15 = vsyncpa [#allocation9], 0 }
   0xb   :  { %17 = vsyncpa [#allocation9 + $0x1], 0  ;;  %s1776_s21 = smov 0   ;;  %s1778_s22 = smov 0  }
   0xc   :  { %s1780_s23 = smov 0   ;;  %s1782_s24 = smov 0  }
   0xd   :  { %s1784_s25 = smov 0   ;;  %s1786_s26 = smov 0  }
   0xe   :  { %s1788_s27 = smov 0   ;;  %s1790_s28 = smov 0  }
   0xf   :  { %s1792_s29 = smov 0   ;;  %s1794_s30 = smov 0  }
  0x10   :  { %s1796_s7 = smov 0  }
  0x11 LB: > { %2326 = sst [smem:[#allocation17_spill]] %s1685_s21  ;;  %s1178_s8 = sadd.s32 4294967295, %s1725_s7   ;;  %s1725_s7 = sphi %s1796_s7, %s23_s7   ;;  %s1721_s30 = sphi %s1794_s30, %s2365_s30   ;;  %s1717_s29 = sphi %s1792_s29, %s2364_s29   ;;  %s1713_s28 = sphi %s1790_s28, %s2355_s28   ;;  %s1709_s27 = sphi %s1788_s27, %s2354_s27   ;;  %s1705_s26 = sphi %s1786_s26, %s2363_s26   ;;  %s1701_s25 = sphi %s1784_s25, %s2362_s25   ;;  %s1697_s24 = sphi %s1782_s24, %s2361_s24   ;;  %s1693_s23 = sphi %s1780_s23, %s2360_s23   ;;  %s1689_s22 = sphi %s1778_s22, %s2359_s22   ;;  %s1685_s21 = sphi %s1776_s21, %s2358_s21  }
  0x12   : > { %2327 = sst [smem:[#allocation18_spill]] %s1717_s29  ;;  %s1179_s9 = sadd.s32 4294967294, %s1725_s7  }
  0x13   : > { %2328 = sst [smem:[#allocation19_spill]] %s1721_s30  ;;  %p59_p0 = scmp.ne.s32.totalorder %s1701_s25, %s1697_s24 }
  0x14   : > { %p1832_p1 = scmp.eq.s32.totalorder %s1178_s8, 0  ;;  %p189_p2 = scmp.ne.s32.totalorder %s1693_s23, %s1689_s22 }
  0x15   : > { %p190_p4 = scmp.eq.s32.totalorder %s1178_s8, 3  ;;  %p195_p5 = scmp.ne.s32.totalorder %s1689_s22, %s1685_s21 }
  0x16   : > { %s2329_s10 = scalar_select %p1832_p1, 1, 0 }
  0x17   : > { %p1841_p3 = por %p1832_p1, %p59_p0  ;;  %p196_p6 = scmp.eq.s32.totalorder %s1179_s9, 3 }
  0x18   : > { %p1847_p7 = por %p190_p4, %p189_p2  ;;  %p1180_p8 = scmp.ge.s32.totalorder %s1725_s7, 1 }
  0x19   : > { %s2330_s12 = scalar_select %p1841_p3, 1, 0 }
  0x1a   : > { %s2331_s13 = scalar_select %p1847_p7, 1, 0 }
  0x1b   : > { %p1852_p9 = por %p196_p6, %p195_p5  ;;  %p203_p10 = scmp.lt.s32.totalorder %s1725_s7, 5 }
  0x1c   : > { %2332 = sst [smem:[#allocation20_spill]] %s2331_s13  ;;  %s1727_s16 = smov [#allocation10]  }
  0x1d   : > { %s2333_s14 = scalar_select %p1852_p9, 1, 0 }
  0x1e   : > { %p1857_p11 = pnand %p1180_p8, %p203_p10  ;;  %s215_s17 = sshll.u32 %s1727_s16, 4  ;;  %s216_s17 = int_to_ptr.vmem [resolvable:$true] %s215_s17 }
  0x1f   : > { %2334 = sst [smem:[#allocation21_spill]] %s2333_s14  ;;  %s1728_s19 = smov [#allocation12]  }
  0x20   : > { %s2335_s15 = scalar_select %p1857_p11, 1, 0 }
  0x21   : > { %p1350_p12 = pneg %p1857_p11  ;;  %s234_s20 = sshll.u32 %s1728_s19, 4  ;;  %s1869_s20 = int_to_ptr.vmem [resolvable:$true] %s234_s20 }
  0x22   : > { %s2337_s1 = sld [smem:[#allocation22_spill]] }
  0x23   : > { %p1865_p13 = pnand %p1350_p12, %p1832_p1 }
  0x25   : > { %p1515_p2 = pneg %p1865_p13 }
  0x28   : > { %s1513_s9 = scalar_lea.hbm %s2337_s1, 2048 }
  0x29   : > { %p1514_p0 = scmp.ne.s32.totalorder %s2337_s1, %s1513_s9  ;;  %p1520_p6 = scmp.lt.u32.totalorder %s1513_s9, %s2337_s1 }
  0x2b   : > { %p1516_p4 = pnand %p1515_p2, %p1514_p0 }
  0x2d   : > { %p1517_p5 = pneg %p1516_p4 }
  0x2f   : > { %p1522_p8 = pnand %p1520_p6, %p1517_p5 }
  0x31   : > { %1525 = shalt.err (!%p1522_p8)
}
  0x32   : > { %s1526_s19 = scalar_lea.vmem %s216_s17, 2048  ;;  %p1534_p7 = scmp.lt.s32.totalorder %s216_s17, %s216_s17 }
  0x33   : > { %p1527_p10 = scmp.ne.s32.totalorder %s216_s17, %s1526_s19  ;;  %p1535_p1 = scmp.lt.s32.totalorder %s1526_s19, %s1526_s19 }
  0x35   : > { %p1529_p12 = pnand %p1527_p10, %p1515_p2  ;;  %p1536_p3 = por %p1535_p1, %p1534_p7 }
  0x37   : > { %p1530_p9 = pneg %p1529_p12 }
  0x39   : > { %p1537_p11 = pnand %p1536_p3, %p1530_p9 }
  0x3b   : > { %1540 = shalt.err (!%p1537_p11)
}
  0x3c   : > { %s1729_s11 = smov 64   ;;  %s1730_s24 = smov 4  }
  0x3d   : > { %1353 = dma.hbm_to_vmem [thread:$0]  (!%p1865_p13), %s2337_s1, 2048, %s216_s17, [#allocation11], %s1729_s11, %s1729_s11, %s1730_s24  }
  0x3e   : > { %s2338_s4 = sld [smem:[#allocation25_spill]] }
  0x44   : > { %s1541_s16 = scalar_lea.hbm %s2338_s4, 2048 }
  0x45   : > { %p1542_p0 = scmp.ne.s32.totalorder %s2338_s4, %s1541_s16  ;;  %p1548_p7 = scmp.lt.u32.totalorder %s1541_s16, %s2338_s4 }
  0x47   : > { %p1544_p1 = pnand %p1542_p0, %p1515_p2 }
  0x49   : > { %p1545_p3 = pneg %p1544_p1 }
  0x4b   : > { %p1550_p9 = pnand %p1548_p7, %p1545_p3 }
  0x4d   : > { %1553 = shalt.err (!%p1550_p9)
}
  0x4e   : > { %s1554_s17 = scalar_lea.vmem %s1869_s20, 2048  ;;  %p1562_p6 = scmp.lt.s32.totalorder %s1869_s20, %s1869_s20 }
  0x4f   : > { %p1555_p11 = scmp.ne.s32.totalorder %s1869_s20, %s1554_s17  ;;  %p1563_p8 = scmp.lt.s32.totalorder %s1554_s17, %s1554_s17 }
  0x51   : > { %p1557_p4 = pnand %p1555_p11, %p1515_p2  ;;  %p1564_p10 = por %p1563_p8, %p1562_p6 }
  0x53   : > { %p1558_p5 = pneg %p1557_p4 }
  0x55   : > { %p1565_p12 = pnand %p1564_p10, %p1558_p5 }
  0x57   : > { %1568 = shalt.err (!%p1565_p12)
}
  0x58   : > { %s1731_s5 = smov 128   ;;  %s1732_s6 = smov 8  }
  0x59   : > { %1356 = dma.hbm_to_vmem [thread:$0]  (!%p1865_p13), %s2338_s4, 2048, %s1869_s20, [#allocation11], %s1731_s5, %s1731_s5, %s1732_s6  }
  0x5a   : > { %s32_s24 = sadd.s32 1, %s1717_s29  ;;  %s35_s21 = sadd.s32 1, %s1721_s30 }
  0x5b   : > { %p33_p2 = scmp.ge.s32.totalorder %s32_s24, 2  ;;  %s39_s14 = ssub.s32 1, %s1721_s30 }
  0x5c   : > { %s40_s8 = smul.u32 %s1717_s29, %s39_s14  ;;  %s46_s9 = sadd.s32 1, %s1705_s26 }
  0x5d   : > { %s2367_s24 = smov (%p33_p2, %s32_s24), 0  ;;  %s2369_s21 = smov (!%p33_p2, %s35_s21), %s1721_s30 }
  0x5e   : > { %p53_p0 = scmp.ne.s32.totalorder %s1705_s26, %s1701_s25  ;;  %p54_p1 = scmp.eq.s32.totalorder %s1725_s7, 0 }
  0x5f   : > { %p37_p3 = scmp.ge.s32.totalorder %s2369_s21, 2  ;;  %s174_s18 = smul.u32 %s1717_s29, %s1721_s30 }
  0x60   : > { %p1931_p13 = por %p54_p1, %p53_p0  ;;  %p1367_p7 = scmp.lt.s32.totalorder %s1725_s7, 4 }
  0x61   : > { %s2371_s21 = smov (%p37_p3, %s2369_s21), 0  ;;  %s251_s16 = sand.u32 1, %s1705_s26  }
  0x62   : > { %s1239_s19 = sshll.u32 %s40_s8, 12  ;;  %s41_s17 = ssub.s32 1, %s2371_s21 }
  0x63   : > { %s175_s5 = smul.u32 %s2371_s21, %s2367_s24  ;;  %s1184_s11 = sshll.u32 %s251_s16, 8 }
  0x64   : > { %s42_s6 = smul.u32 %s41_s17, %s2367_s24  ;;  %s2340_s1 = sadd.s32 1, %s1693_s23 }
  0x65   : > { %s176_s13 = ssub.s32 %s174_s18, %s175_s5  ;;  %s1954_s2 = scalar_lea.hbm %s2301_s0, %s1239_s19 }
  0x66   : > { %s43_s14 = ssub.s32 %s40_s8, %s42_s6  ;;  %p177_p9 = scmp.eq.s32.totalorder %s176_s13, 0 }
  0x67   : > { %p44_p11 = scmp.eq.s32.totalorder %s43_s14, 0  ;;  %s255_s17 = scalar_lea.vmem [#allocation7], %s1184_s11 }
  0x68   : > { %s1946_s4 = scalar_select %p177_p9, %s1693_s23, %s2340_s1  }
  0x69   : > { %s1949_s30 = scalar_select %p44_p11, %s1705_s26, %s46_s9  }
  0x6a   : > { %s265_s18 = sshll.u32 %s255_s17, 4  ;;  %p1962_p4 = pnand %p1367_p7, %p1931_p13  ;;  %s1956_s18 = int_to_ptr.vmem [resolvable:$true] %s265_s18 }
  0x6b   : > { %s1966_s8 = scalar_lea.sflag [#allocation8], %s251_s16  ;;  %s1569_s3 = scalar_lea.hbm %s1954_s2, 4096 }
  0x6c   : > { %p1570_p5 = scmp.ne.s32.totalorder %s1954_s2, %s1569_s3  ;;  %p1571_p6 = pneg %p1962_p4 }
  0x6d   : > { %s1574_s20 = scalar_lea.hbm %s2301_s0, 8192  ;;  %p1575_p12 = scmp.lt.u32.totalorder %s1954_s2, %s2301_s0 }
  0x6e   : > { %p1572_p8 = pnand %p1571_p6, %p1570_p5  ;;  %p1576_p2 = scmp.lt.u32.totalorder %s1574_s20, %s1569_s3 }
  0x6f   : > { %p1578_p1 = scmp.lt.u32.totalorder %s1569_s3, %s1954_s2 }
  0x70   : > { %p1573_p10 = pneg %p1572_p8  ;;  %p1577_p0 = por %p1576_p2, %p1575_p12 }
  0x72   : > { %p1579_p3 = por %p1578_p1, %p1577_p0 }
  0x74   : > { %p1580_p13 = pnand %p1579_p3, %p1573_p10 }
  0x76   : > { %1583 = shalt.err (!%p1580_p13)
}
  0x77   : > { %s1584_s16 = scalar_lea.vmem %s1956_s18, 4096  ;;  %s1733_s6 = smov [#allocation7]  }
  0x78   : > { %p1585_p7 = scmp.ne.s32.totalorder %s1956_s18, %s1584_s16  ;;  %s1589_s13 = sshll.u32 %s1733_s6, 4  ;;  %s1590_s13 = int_to_ptr.vmem [resolvable:$false] %s1589_s13 }
  0x79   : > { %s1591_s11 = scalar_lea.vmem %s1590_s13, 8192  ;;  %p1592_p5 = scmp.lt.s32.totalorder %s1956_s18, %s1590_s13 }
  0x7a   : > { %p1587_p9 = pnand %p1585_p7, %p1571_p6  ;;  %p1593_p8 = scmp.lt.s32.totalorder %s1591_s11, %s1584_s16 }
  0x7c   : > { %p1588_p11 = pneg %p1587_p9  ;;  %p1594_p12 = por %p1593_p8, %p1592_p5 }
  0x7e   : > { %p1595_p2 = pnand %p1594_p12, %p1588_p11 }
  0x80   : > { %1598 = shalt.err (!%p1595_p2)
}
  0x81   : > { %s1734_s14 = smov 256   ;;  %s1735_s17 = smov 16  }
  0x82   : > { %1360 = dma.hbm_to_vmem [thread:$0]  (!%p1962_p4), %s1954_s2, 4096, %s1956_s18, %s1966_s8, %s1734_s14, %s1734_s14, %s1735_s17  }
  0x83   : > { %p2342_p6 = scmp.ne.s32.totalorder %s2335_s15, 0 }
  0x84   : > { %s279_s3 = sand.u32 (!%p2342_p6), 1, %s1701_s25   ;;  %p2343_p10 = scmp.ne.s32.totalorder (!%p2342_p6), %s2330_s12, 0 }
  0x85   : > { %277 = sbr.rel (%p2342_p6) target bundleno = 812 (0x32c), region = 44  ;;  %s1189_s29 = sshll.u32 (!%p2342_p6), %s279_s3, 8 }
  0x86   : > { %s280_s9 = scalar_lea.sflag (!%p2342_p6), [#allocation8], %s279_s3  ;;  %s1997_s20 = scalar_lea.vmem (!%p2342_p6), [#allocation7], %s1189_s29 }
  0x8c   : > { %1672 = dma.done.wait (%p2343_p10), %s280_s9, 4096  }
  0x8d   : > { %1674 = vsyncadd (%p2343_p10), %s280_s9, 4294963200  ;;  %p2344_p0 = scmp.ne.s32.totalorder %s2329_s10, 0 }
  0x8f   : > { %1676 = dma.done.wait (%p2344_p0), [#allocation11], 4096  }
  0x90   : > { %1678 = vsyncadd (%p2344_p0), [#allocation11], 4294963200  ;;  %s317_s2 = sand.u32 1, %s1689_s22   ;;  %s1193_s15 = sshll.u32 %s1709_s27, 7 }
  0x91   : > { %s1192_s18 = sshll.u32 %s317_s2, 8  ;;  %p1194_p4 = scmp.ne.s32.totalorder %s1713_s28, 0 }
  0x92   : > { %s2011_s1 = scalar_lea.vmem [#allocation13], %s1192_s18  ;;  %p1195_p1 = scmp.ne.s32.totalorder (!%p1194_p4), %s1709_s27, 0 }
  0x93   : > { %330 = sbr.rel (%p1194_p4) target bundleno = 470 (0x1d6), region = 60 }
  0x9a   : > { %334 = sbr.rel (%p1195_p1) target bundleno = 161 (0xa1), region = 64  ;;  %v1736_v0 = vmov (!%p1195_p1), 0.0  }
  0x9b   : > { %335 = vst [vmem:[#allocation3] sm:$0x1] (!%p1195_p1), %v1736_v0  ;;  %336 = vst [vmem:[#allocation4] sm:$0x1] (!%p1195_p1), %v1736_v0 }
  0xa1 PF: > { %v1471_v1 = vld [vmem:[#allocation10 + $0x40] sm:$0xff]   ;;  %v1473_v3 = vld [vmem:[#allocation10 + $0x48] sm:$0xff]   ;;  %v1475_v5 = vld [vmem:[#allocation10 + $0x50] sm:$0xff]   ;;  %s2051_s10 = scalar_lea.vmem [#allocation2], %s1193_s15 }
  0xa2   : > { %v1472_v2 = vld [vmem:[#allocation10] sm:$0xff]   ;;  %1242 = vmatprep.subr.bf16.mxu0 %v1471_v1  ;;  %1306 = vmatprep.subr.bf16.mxu1 %v1471_v1  ;;  %v1474_v4 = vld [vmem:[#allocation10 + $0x8] sm:$0xff]   ;;  %v1476_v6 = vld [vmem:[#allocation10 + $0x10] sm:$0xff]  }
  0xa3   : > { %1243 = vmatpush3.bf16.msra.mxu0 %v1472_v2  ;;  %1314 = vmatpush3.bf16.msra.mxu1 %v1472_v2  ;;  %v1477_v7 = vld [vmem:[#allocation10 + $0x58] sm:$0xff]   ;;  %v1479_v9 = vld [vmem:[#allocation10 + $0x60] sm:$0xff]   ;;  %v1481_v11 = vld [vmem:[#allocation10 + $0x68] sm:$0xff]  }
  0xa4   : > { %1244 = vmatprep.subr.bf16.mxu0 %v1473_v3  ;;  %1307 = vmatprep.subr.bf16.mxu1 %v1473_v3  ;;  %v1478_v8 = vld [vmem:[#allocation10 + $0x18] sm:$0xff]   ;;  %v1480_v10 = vld [vmem:[#allocation10 + $0x20] sm:$0xff]   ;;  %v338_v12 = vld [vmem:[%s1997_s20 + $0x8] sm:$0xff] }
  0xa5   : > { %v340_v13 = vld [vmem:[%s1997_s20 + $0x18] sm:$0xff]  ;;  %v354_v15 = vld [vmem:[%s1997_s20 + $0x88] sm:$0xff]  ;;  %v1483_v18 = vld [vmem:[#allocation10 + $0x70] sm:$0xff]  }
  0xa6   : > { %v370_v14 = vpack.c.bf16 %v340_v13, %v338_v12  ;;  %v1482_v16 = vld [vmem:[#allocation10 + $0x28] sm:$0xff]   ;;  %v356_v17 = vld [vmem:[%s1997_s20 + $0x98] sm:$0xff]  ;;  %v1484_v20 = vld [vmem:[#allocation10 + $0x30] sm:$0xff]  }
  0xa7   : > { %1245 = vmatpush3.bf16.msra.mxu0 %v1474_v4  ;;  %1315 = vmatpush3.bf16.msra.mxu1 %v1474_v4  ;;  %v378_v19 = vpack.c.bf16 %v356_v17, %v354_v15  ;;  %v1485_v21 = vld [vmem:[#allocation10 + $0x78] sm:$0xff]   ;;  %v337_v23 = vld [vmem:[%s1997_s20] sm:$0xff]  ;;  %v339_v24 = vld [vmem:[%s1997_s20 + $0x10] sm:$0xff] }
  0xa8   : > { %1246 = vmatprep.subr.bf16.mxu0 %v1475_v5  ;;  %1308 = vmatprep.subr.bf16.mxu1 %v1475_v5  ;;  %v1486_v22 = vld [vmem:[#allocation10 + $0x38] sm:$0xff]   ;;  %v342_v25 = vld [vmem:[%s1997_s20 + $0x28] sm:$0xff]  ;;  %v353_v26 = vld [vmem:[%s1997_s20 + $0x80] sm:$0xff]  ;;  %v369_v31 = vpack.c.bf16 %v339_v24, %v337_v23 }
  0xa9   : > { %545 = vmatprep.mubr.bf16.mxu0 %v370_v14  ;;  %577 = vmatprep.mubr.bf16.mxu1 %v378_v19  ;;  %v355_v27 = vld [vmem:[%s1997_s20 + $0x90] sm:$0xff]  ;;  %v344_v28 = vld [vmem:[%s1997_s20 + $0x38] sm:$0xff]  ;;  %v358_v29 = vld [vmem:[%s1997_s20 + $0xa8] sm:$0xff] }
  0xaa   : > { %v360_v30 = vld [vmem:[%s1997_s20 + $0xb8] sm:$0xff]  ;;  %v377_v32 = vpack.c.bf16 %v355_v27, %v353_v26  ;;  %v372_v33 = vpack.c.bf16 %v344_v28, %v342_v25  ;;  %v341_v35 = vld [vmem:[%s1997_s20 + $0x20] sm:$0xff]  ;;  %v343_v36 = vld [vmem:[%s1997_s20 + $0x30] sm:$0xff] }
  0xab   : > { %1247 = vmatpush3.bf16.msra.mxu0 %v1476_v6  ;;  %1316 = vmatpush3.bf16.msra.mxu1 %v1476_v6  ;;  %v380_v34 = vpack.c.bf16 %v360_v30, %v358_v29  ;;  %v346_v37 = vld [vmem:[%s1997_s20 + $0x48] sm:$0xff]  ;;  %v357_v38 = vld [vmem:[%s1997_s20 + $0xa0] sm:$0xff]  ;;  %v359_v39 = vld [vmem:[%s1997_s20 + $0xb0] sm:$0xff]  ;;  %v371_v43 = vpack.c.bf16 %v343_v36, %v341_v35 }
  0xac   : > { %1248 = vmatprep.subr.bf16.mxu0 %v1477_v7  ;;  %1309 = vmatprep.subr.bf16.mxu1 %v1477_v7  ;;  %v348_v40 = vld [vmem:[%s1997_s20 + $0x58] sm:$0xff]  ;;  %v362_v41 = vld [vmem:[%s1997_s20 + $0xc8] sm:$0xff]  ;;  %v379_v44 = vpack.c.bf16 %v359_v39, %v357_v38  ;;  %v345_v47 = vld [vmem:[%s1997_s20 + $0x40] sm:$0xff] }
  0xad   : > { %v364_v42 = vld [vmem:[%s1997_s20 + $0xd8] sm:$0xff]  ;;  %v374_v45 = vpack.c.bf16 %v348_v40, %v346_v37  ;;  %v347_v48 = vld [vmem:[%s1997_s20 + $0x50] sm:$0xff]  ;;  %v350_v49 = vld [vmem:[%s1997_s20 + $0x68] sm:$0xff] }
  0xae   : > { %v382_v46 = vpack.c.bf16 %v364_v42, %v362_v41  ;;  %v361_v50 = vld [vmem:[%s1997_s20 + $0xc0] sm:$0xff]  ;;  %v363_v51 = vld [vmem:[%s1997_s20 + $0xd0] sm:$0xff]  ;;  %v352_v52 = vld [vmem:[%s1997_s20 + $0x78] sm:$0xff]  ;;  %v373_v55 = vpack.c.bf16 %v347_v48, %v345_v47 }
  0xaf   : > { %1249 = vmatpush3.bf16.msra.mxu0 %v1478_v8  ;;  %1317 = vmatpush3.bf16.msra.mxu1 %v1478_v8  ;;  %v366_v53 = vld [vmem:[%s1997_s20 + $0xe8] sm:$0xff]  ;;  %v368_v54 = vld [vmem:[%s1997_s20 + $0xf8] sm:$0xff]  ;;  %v381_v56 = vpack.c.bf16 %v363_v51, %v361_v50  ;;  %v376_v57 = vpack.c.bf16 %v352_v52, %v350_v49  ;;  %v349_v59 = vld [vmem:[%s1997_s20 + $0x60] sm:$0xff] }
  0xb0   : > { %1250 = vmatprep.subr.bf16.mxu0 %v1479_v9  ;;  %1310 = vmatprep.subr.bf16.mxu1 %v1479_v9  ;;  %v384_v58 = vpack.c.bf16 %v368_v54, %v366_v53  ;;  %v351_v60 = vld [vmem:[%s1997_s20 + $0x70] sm:$0xff]  ;;  %v365_v61 = vld [vmem:[%s1997_s20 + $0xe0] sm:$0xff] }
  0xb1   : > { %v367_v62 = vld [vmem:[%s1997_s20 + $0xf0] sm:$0xff]  ;;  %v375_v63 = vpack.c.bf16 %v351_v60, %v349_v59 }
  0xb2   : > { %v383_v0 = vpack.c.bf16 %v367_v62, %v365_v61 }
  0xb3   : > { %1251 = vmatpush3.bf16.msra.mxu0 %v1480_v10  ;;  %1318 = vmatpush3.bf16.msra.mxu1 %v1480_v10 }
  0xb4   : > { %1252 = vmatprep.subr.bf16.mxu0 %v1481_v11  ;;  %1311 = vmatprep.subr.bf16.mxu1 %v1481_v11 }
  0xb7   : > { %1253 = vmatpush3.bf16.msra.mxu0 %v1482_v16  ;;  %1319 = vmatpush3.bf16.msra.mxu1 %v1482_v16 }
  0xb8   : > { %1254 = vmatprep.subr.bf16.mxu0 %v1483_v18  ;;  %1312 = vmatprep.subr.bf16.mxu1 %v1483_v18 }
  0xbb   : > { %1255 = vmatpush3.bf16.msra.mxu0 %v1484_v20  ;;  %1320 = vmatpush3.bf16.msra.mxu1 %v1484_v20 }
  0xbc   : > { %1256 = vmatprep.subr.bf16.mxu0 %v1485_v21  ;;  %1313 = vmatprep.subr.bf16.mxu1 %v1485_v21 }
  0xbf   : > { %1257 = vmatpush3.bf16.msra.mxu0 %v1486_v22  ;;  %1321 = vmatpush3.bf16.msra.mxu1 %v1486_v22 }
  0xc2   : > { %546 = vmatmul.mubr.bf16.vlgmr.msra.gmra.mrb[0].mxu0 %v369_v31  ;;  %578 = vmatmul.mubr.bf16.vlgmr.msra.gmra.mrb[0].mxu1 %v377_v32 }
  0xc3   : > { %553 = vmatprep.mubr.bf16.mxu0 %v372_v33  ;;  %585 = vmatprep.mubr.bf16.mxu1 %v380_v34 }
  0xca   : > { %554 = vmatmul.mubr.bf16.gmra.mrb[4].mxu0 %v371_v43  ;;  %586 = vmatmul.mubr.bf16.gmra.mrb[4].mxu1 %v379_v44 }
  0xcb   : > { %561 = vmatprep.mubr.bf16.mxu0 %v374_v45  ;;  %593 = vmatprep.mubr.bf16.mxu1 %v382_v46 }
  0xd2   : > { %562 = vmatmul.mubr.bf16.gmra.mrb[8].mxu0 %v373_v55  ;;  %594 = vmatmul.mubr.bf16.gmra.mrb[8].mxu1 %v381_v56 }
  0xd3   : > { %569 = vmatprep.mubr.bf16.mxu0 %v376_v57  ;;  %601 = vmatprep.mubr.bf16.mxu1 %v384_v58 }
  0xda   : > { %570 = vmatmul.mubr.bf16.gmra.mrb[12].mxu0 %v375_v63  ;;  %602 = vmatmul.mubr.bf16.gmra.mrb[12].mxu1 %v383_v0 }
 0x195   : > { %v1258_v1 = vpop.f32.mrb[0].mxu0  ;;  %v1282_v2 = vpop.f32.mrb[0].mxu1 }
 0x196   : > { %v1259_v3 = vpop.f32.mrb[1].mxu0  ;;  %v1283_v4 = vpop.f32.mrb[1].mxu1 }
 0x197   : > { %v1260_v5 = vadd.f32 %v1259_v3, %v1258_v1  ;;  %v1261_v6 = vpop.f32.mrb[2].mxu0  ;;  %v2047_v7 = vadd.f32 %v1283_v4, %v1282_v2  ;;  %v1285_v8 = vpop.f32.mrb[2].mxu1 }
 0x198   : > { %v1262_v9 = vpop.f32.mrb[3].mxu0  ;;  %v1286_v10 = vpop.f32.mrb[3].mxu1 }
 0x199   : > { %611 = vst [vmem:[%s2051_s10] sm:$0xff] %v1260_v5  ;;  %v1263_v11 = vadd.f32 %v1262_v9, %v1261_v6  ;;  %619 = vst [vmem:[%s2051_s10 + $0x40] sm:$0xff] %v2047_v7  ;;  %v2056_v12 = vadd.f32 %v1286_v10, %v1285_v8  ;;  %v652_v13 = vmul.f32 %v1260_v5, %v1260_v5 }
 0x19a   : > { %v660_v6 = vmul.f32 %v2047_v7, %v2047_v7 }
 0x19b   : > { %612 = vst [vmem:[%s2051_s10 + $0x8] sm:$0xff] %v1263_v11  ;;  %v628_v14 = vadd.f32 %v1263_v11, %v1260_v5  ;;  %v653_v15 = vmul.f32 %v1263_v11, %v1263_v11  ;;  %620 = vst [vmem:[%s2051_s10 + $0x48] sm:$0xff] %v2056_v12  ;;  %v661_v10 = vmul.f32 %v2056_v12, %v2056_v12 }
 0x19d   : > { %v668_v16 = vadd.f32 %v653_v15, %v652_v13  ;;  %v1264_v17 = vpop.f32.mrb[4].mxu0  ;;  %v1288_v18 = vpop.f32.mrb[4].mxu1 }
 0x19e   : > { %v1265_v19 = vpop.f32.mrb[5].mxu0  ;;  %v1289_v20 = vpop.f32.mrb[5].mxu1 }
 0x19f   : > { %v1266_v21 = vadd.f32 %v1265_v19, %v1264_v17  ;;  %v1267_v22 = vpop.f32.mrb[6].mxu0  ;;  %v2061_v23 = vadd.f32 %v1289_v20, %v1288_v18  ;;  %v1291_v24 = vpop.f32.mrb[6].mxu1 }
 0x1a0   : > { %v1268_v25 = vpop.f32.mrb[7].mxu0  ;;  %v1292_v26 = vpop.f32.mrb[7].mxu1 }
 0x1a1   : > { %613 = vst [vmem:[%s2051_s10 + $0x10] sm:$0xff] %v1266_v21  ;;  %v629_v27 = vadd.f32 %v1266_v21, %v628_v14  ;;  %v654_v28 = vmul.f32 %v1266_v21, %v1266_v21  ;;  %v1269_v29 = vadd.f32 %v1268_v25, %v1267_v22  ;;  %621 = vst [vmem:[%s2051_s10 + $0x50] sm:$0xff] %v2061_v23 }
 0x1a2   : > { %v1293_v30 = vadd.f32 %v1292_v26, %v1291_v24  ;;  %v662_v14 = vmul.f32 %v2061_v23, %v2061_v23 }
 0x1a3   : > { %v669_v31 = vadd.f32 %v668_v16, %v654_v28  ;;  %614 = vst [vmem:[%s2051_s10 + $0x18] sm:$0xff] %v1269_v29  ;;  %v630_v32 = vadd.f32 %v1269_v29, %v629_v27  ;;  %v655_v33 = vmul.f32 %v1269_v29, %v1269_v29 }
 0x1a4   : > { %622 = vst [vmem:[%s2051_s10 + $0x58] sm:$0xff] %v1293_v30  ;;  %v663_v17 = vmul.f32 %v1293_v30, %v1293_v30 }
 0x1a5   : > { %v670_v34 = vadd.f32 %v669_v31, %v655_v33  ;;  %v1270_v35 = vpop.f32.mrb[8].mxu0  ;;  %v1294_v36 = vpop.f32.mrb[8].mxu1 }
 0x1a6   : > { %v1271_v37 = vpop.f32.mrb[9].mxu0  ;;  %v1295_v38 = vpop.f32.mrb[9].mxu1 }
 0x1a7   : > { %v1272_v39 = vadd.f32 %v1271_v37, %v1270_v35  ;;  %v1273_v40 = vpop.f32.mrb[10].mxu0  ;;  %v1296_v41 = vadd.f32 %v1295_v38, %v1294_v36  ;;  %v1297_v42 = vpop.f32.mrb[10].mxu1 }
 0x1a8   : > { %v1274_v43 = vpop.f32.mrb[11].mxu0  ;;  %v1298_v44 = vpop.f32.mrb[11].mxu1 }
 0x1a9   : > { %615 = vst [vmem:[%s2051_s10 + $0x20] sm:$0xff] %v1272_v39  ;;  %v631_v45 = vadd.f32 %v1272_v39, %v630_v32  ;;  %v656_v46 = vmul.f32 %v1272_v39, %v1272_v39  ;;  %v1275_v47 = vadd.f32 %v1274_v43, %v1273_v40  ;;  %623 = vst [vmem:[%s2051_s10 + $0x60] sm:$0xff] %v1296_v41  ;;  %v627_v40 = vld [vmem:[#allocation3] sm:$0x1]  ;;  %v651_v43 = vld [vmem:[#allocation4] sm:$0x1] }
 0x1aa   : > { %v1299_v48 = vadd.f32 %v1298_v44, %v1297_v42  ;;  %v664_v21 = vmul.f32 %v1296_v41, %v1296_v41 }
 0x1ab   : > { %v671_v49 = vadd.f32 %v670_v34, %v656_v46  ;;  %616 = vst [vmem:[%s2051_s10 + $0x28] sm:$0xff] %v1275_v47  ;;  %v632_v50 = vadd.f32 %v1275_v47, %v631_v45  ;;  %v657_v51 = vmul.f32 %v1275_v47, %v1275_v47 }
 0x1ac   : > { %624 = vst [vmem:[%s2051_s10 + $0x68] sm:$0xff] %v1299_v48  ;;  %v665_v25 = vmul.f32 %v1299_v48, %v1299_v48 }
 0x1ad   : > { %v672_v52 = vadd.f32 %v671_v49, %v657_v51  ;;  %v1276_v53 = vpop.f32.mrb[12].mxu0  ;;  %v1300_v54 = vpop.f32.mrb[12].mxu1 }
 0x1ae   : > { %v1277_v55 = vpop.f32.mrb[13].mxu0  ;;  %v1301_v56 = vpop.f32.mrb[13].mxu1 }
 0x1af   : > { %v1278_v57 = vadd.f32 %v1277_v55, %v1276_v53  ;;  %v1279_v58 = vpop.f32.mrb[14].mxu0  ;;  %v1302_v59 = vadd.f32 %v1301_v56, %v1300_v54  ;;  %v1303_v60 = vpop.f32.mrb[14].mxu1 }
 0x1b0   : > { %v1280_v61 = vpop.f32.mrb[15].mxu0  ;;  %v1304_v62 = vpop.f32.mrb[15].mxu1 }
 0x1b1   : > { %617 = vst [vmem:[%s2051_s10 + $0x30] sm:$0xff] %v1278_v57  ;;  %v633_v63 = vadd.f32 %v1278_v57, %v632_v50  ;;  %v658_v0 = vmul.f32 %v1278_v57, %v1278_v57  ;;  %v1281_v1 = vadd.f32 %v1280_v61, %v1279_v58  ;;  %625 = vst [vmem:[%s2051_s10 + $0x70] sm:$0xff] %v1302_v59 }
 0x1b2   : > { %v1305_v2 = vadd.f32 %v1304_v62, %v1303_v60  ;;  %v666_v26 = vmul.f32 %v1302_v59, %v1302_v59 }
 0x1b3   : > { %v673_v3 = vadd.f32 %v672_v52, %v658_v0  ;;  %618 = vst [vmem:[%s2051_s10 + $0x38] sm:$0xff] %v1281_v1  ;;  %v634_v4 = vadd.f32 %v1281_v1, %v633_v63  ;;  %v659_v5 = vmul.f32 %v1281_v1, %v1281_v1 }
 0x1b4   : > { %626 = vst [vmem:[%s2051_s10 + $0x78] sm:$0xff] %v1305_v2  ;;  %v667_v31 = vmul.f32 %v1305_v2, %v1305_v2 }
 0x1b5   : > { %v635_v8 = vadd.f32 %v2047_v7, %v634_v4  ;;  %v674_v9 = vadd.f32 %v673_v3, %v659_v5 }
 0x1b7   : > { %v636_v11 = vadd.f32 %v2056_v12, %v635_v8  ;;  %v675_v13 = vadd.f32 %v674_v9, %v660_v6 }
 0x1b9   : > { %v676_v15 = vadd.f32 %v675_v13, %v661_v10  ;;  %v637_v16 = vadd.f32 %v2061_v23, %v636_v11 }
 0x1bb   : > { %v638_v18 = vadd.f32 %v1293_v30, %v637_v16  ;;  %v677_v19 = vadd.f32 %v676_v15, %v662_v14 }
 0x1bd   : > { %v639_v20 = vadd.f32 %v1296_v41, %v638_v18  ;;  %v678_v22 = vadd.f32 %v677_v19, %v663_v17 }
 0x1bf   : > { %v679_v7 = vadd.f32 %v678_v22, %v664_v21  ;;  %v640_v24 = vadd.f32 %v1299_v48, %v639_v20 }
 0x1c1   : > { %v680_v27 = vadd.f32 %v679_v7, %v665_v25  ;;  %v641_v28 = vadd.f32 %v1302_v59, %v640_v24 }
 0x1c3   : > { %v681_v12 = vadd.f32 %v680_v27, %v666_v26  ;;  %v642_v29 = vadd.f32 %v1305_v2, %v641_v28 }
 0x1c5   : > { %v643_v32 = vrot.slane %v642_v29, 4  ;;  %v682_v33 = vadd.f32 %v681_v12, %v667_v31 }
 0x1c7   : > { %v644_v34 = vadd.f32 %v643_v32, %v642_v29  ;;  %v683_v35 = vrot.slane %v682_v33, 4 }
 0x1c9   : > { %v645_v23 = vrot.slane %v644_v34, 2  ;;  %v684_v36 = vadd.f32 %v683_v35, %v682_v33 }
 0x1cb   : > { %v646_v30 = vadd.f32 %v645_v23, %v644_v34  ;;  %v685_v37 = vrot.slane %v684_v36, 2 }
 0x1cd   : > { %v647_v38 = vrot.slane %v646_v30, 1  ;;  %v686_v39 = vadd.f32 %v685_v37, %v684_v36 }
 0x1cf   : > { %v648_v41 = vadd.f32 %v647_v38, %v646_v30  ;;  %v687_v42 = vrot.slane %v686_v39, 1 }
 0x1d1   : > { %v649_v44 = vadd.f32 %v648_v41, %v627_v40  ;;  %v688_v45 = vadd.f32 %v687_v42, %v686_v39 }
 0x1d3   : > { %650 = vst [vmem:[#allocation3] sm:$0x1] %v649_v44  ;;  %v689_v46 = vadd.f32 %v688_v45, %v651_v43 }
 0x1d5   : > { %690 = vst [vmem:[#allocation4] sm:$0x1] %v689_v46 }
 0x1d6 PF: > { %p1212_p3 = scmp.ne.s32.totalorder %s1713_s28, 1 }
 0x1d7   : > { %p1213_p13 = scmp.ne.s32.totalorder (!%p1212_p3), %s1709_s27, 0 }
 0x1d8   : > { %694 = sbr.rel (%p1212_p3) target bundleno = 784 (0x310), region = 68 }
 0x1df   : > { %698 = sbr.rel (%p1213_p13) target bundleno = 508 (0x1fc), region = 72  ;;  %v699_v47 = vld [vmem:[#allocation3] sm:$0x1] (!%p1213_p13)  ;;  %v701_v48 = vld [vmem:[#allocation4] sm:$0x1] (!%p1213_p13)  ;;  %s2345_s19 = sld [smem:[#allocation23_spill]] (!%p1213_p13) }
 0x1e0   : > { %v700_v49 = vmul.f32 (!%p1213_p13), 0.00390625, %v699_v47  ;;  %v702_v50 = vmul.f32 (!%p1213_p13), 0.00390625, %v701_v48  ;;  %s2346_s6 = sld [smem:[#allocation24_spill]] (!%p1213_p13) }
 0x1e2   : > { %v703_v51 = vmul.f32 (!%p1213_p13), %v700_v49, %v700_v49 }
 0x1e4   : > { %v704_v52 = vsub.f32 (!%p1213_p13), %v702_v50, %v703_v51 }
 0x1e5   : > { %v706_v55 = vld [vmem:[%s2345_s19] sm:$0x1] (!%p1213_p13) }
 0x1e6   : > { %v705_v53 = vmax.f32 %v704_v52, 0.0  ;;  %v711_v58 = vld [vmem:[%s2346_s6] sm:$0x1] }
 0x1e8   : > { %v707_v54 = vadd.f32 1e-05, %v705_v53 }
 0x1ea   : > { %1487 = vrsqrt.f32 %v707_v54 }
 0x1f4   : > { %v1488_v56 = vpop.eup %1487 }
 0x1f5   : > { %v709_v57 = vmul.f32 %v1488_v56, %v706_v55 }
 0x1f7   : > { %710 = vst [vmem:[#allocation5] sm:$0x1] %v709_v57  ;;  %v712_v59 = vmul.f32 %v709_v57, %v700_v49 }
 0x1f9   : > { %v713_v60 = vsub.f32 %v711_v58, %v712_v59 }
 0x1fb   : > { %714 = vst [vmem:[#allocation6] sm:$0x1] %v713_v60 }
 0x1fc PF: > { %v1489_v61 = vld [vmem:[#allocation12 + $0x4] ss:$8 sps:$4 sm:$0xff]   ;;  %v1491_v62 = vld [vmem:[#allocation12] ss:$8 sps:$4 sm:$0xff]   ;;  %v1737_v63 = vmov 0   ;;  %s2097_s13 = scalar_lea.vmem [#allocation2], %s1193_s15 }
 0x1fd   : > { %942 = vmatprep.mubr.bf16.mxu0 %v1737_v63  ;;  %982 = vmatprep.mubr.bf16.mxu1 %v1737_v63  ;;  %v1492_v0 = vld [vmem:[#allocation12 + $0x14] ss:$8 sps:$4 sm:$0xff]   ;;  %v1494_v1 = vld [vmem:[#allocation12 + $0x10] ss:$8 sps:$4 sm:$0xff]   ;;  %v1495_v2 = vld [vmem:[#allocation12 + $0x24] ss:$8 sps:$4 sm:$0xff]  }
 0x1fe   : > { %910 = vmatprep.subr.bf16.mxu0 %v1489_v61  ;;  %1322 = vmatprep.subr.bf16.mxu1 %v1489_v61  ;;  %v1497_v3 = vld [vmem:[#allocation12 + $0x20] ss:$8 sps:$4 sm:$0xff]   ;;  %v1498_v4 = vld [vmem:[#allocation12 + $0x34] ss:$8 sps:$4 sm:$0xff]   ;;  %v1500_v5 = vld [vmem:[#allocation12 + $0x30] ss:$8 sps:$4 sm:$0xff]  }
 0x1ff   : > { %911 = vmatpush1.bf16.msra.mxu0 %v1491_v62  ;;  %1330 = vmatpush1.bf16.msra.mxu1 %v1491_v62  ;;  %v1501_v6 = vld [vmem:[#allocation12 + $0x44] ss:$8 sps:$4 sm:$0xff]   ;;  %v1503_v8 = vld [vmem:[#allocation12 + $0x40] ss:$8 sps:$4 sm:$0xff]   ;;  %v2100_v10 = vld [vmem:[#allocation5] ss:$0 sm:$0xff] }
 0x200   : > { %912 = vmatprep.subr.bf16.mxu0 %v1492_v0  ;;  %1323 = vmatprep.subr.bf16.mxu1 %v1492_v0  ;;  %v716_v9 = vld [vmem:[%s2097_s13] sm:$0xff]  ;;  %v717_v11 = vld [vmem:[%s2097_s13 + $0x8] sm:$0xff]  ;;  %v1506_v21 = vld [vmem:[#allocation12 + $0x50] ss:$8 sps:$4 sm:$0xff]   ;;  %s2347_s17 = sld [smem:[#allocation26_spill]] }
 0x201   : > { %v724_v13 = vld [vmem:[%s2097_s13 + $0x40] sm:$0xff]  ;;  %v725_v14 = vld [vmem:[%s2097_s13 + $0x48] sm:$0xff]  ;;  %v739_v16 = vmul.f32 %v2100_v10, %v716_v9  ;;  %v740_v17 = vmul.f32 %v2100_v10, %v717_v11  ;;  %v718_v27 = vld [vmem:[%s2097_s13 + $0x10] sm:$0xff] }
 0x202   : > { %v1504_v15 = vld [vmem:[#allocation12 + $0x54] ss:$8 sps:$4 sm:$0xff]   ;;  %v747_v19 = vmul.f32 %v2100_v10, %v724_v13  ;;  %v748_v20 = vmul.f32 %v2100_v10, %v725_v14  ;;  %v1507_v22 = vld [vmem:[#allocation12 + $0x64] ss:$8 sps:$4 sm:$0xff]   ;;  %v1509_v29 = vld [vmem:[#allocation12 + $0x60] ss:$8 sps:$4 sm:$0xff]   ;;  %v741_v34 = vmul.f32 %v2100_v10, %v718_v27 }
 0x203   : > { %913 = vmatpush1.bf16.msra.mxu0 %v1494_v1  ;;  %1331 = vmatpush1.bf16.msra.mxu1 %v1494_v1  ;;  %v2107_v18 = vld [vmem:[#allocation6] ss:$0 sm:$0xff]  ;;  %v719_v28 = vld [vmem:[%s2097_s13 + $0x18] sm:$0xff]  ;;  %v726_v12 = vld [vmem:[%s2097_s13 + $0x50] sm:$0xff] }
 0x204   : > { %914 = vmatprep.subr.bf16.mxu0 %v1495_v2  ;;  %1324 = vmatprep.subr.bf16.mxu1 %v1495_v2  ;;  %v762_v7 = vadd.f32 %v2107_v18, %v739_v16  ;;  %v763_v24 = vadd.f32 %v2107_v18, %v740_v17  ;;  %v770_v25 = vadd.f32 %v2107_v18, %v747_v19  ;;  %v727_v31 = vld [vmem:[%s2097_s13 + $0x58] sm:$0xff]  ;;  %v720_v46 = vld [vmem:[%s2097_s13 + $0x20] sm:$0xff]  ;;  %v721_v47 = vld [vmem:[%s2097_s13 + $0x28] sm:$0xff] }
 0x205   : > { %v771_v26 = vadd.f32 %v2107_v18, %v748_v20  ;;  %v1510_v32 = vld [vmem:[#allocation12 + $0x74] ss:$8 sps:$4 sm:$0xff]   ;;  %v742_v35 = vmul.f32 %v2100_v10, %v719_v28  ;;  %v749_v23 = vmul.f32 %v2100_v10, %v726_v12  ;;  %v750_v38 = vmul.f32 %v2100_v10, %v727_v31  ;;  %v1512_v39 = vld [vmem:[#allocation12 + $0x70] ss:$8 sps:$4 sm:$0xff]   ;;  %v729_v49 = vld [vmem:[%s2097_s13 + $0x68] sm:$0xff] }
 0x206   : > { %v778_v33 = vmax.f32 %v762_v7, 0.0  ;;  %v779_v36 = vmax.f32 %v763_v24, 0.0  ;;  %v786_v30 = vmax.f32 %v770_v25, 0.0  ;;  %v764_v40 = vadd.f32 %v2107_v18, %v741_v34  ;;  %v728_v48 = vld [vmem:[%s2097_s13 + $0x60] sm:$0xff]  ;;  %v722_v1 = vld [vmem:[%s2097_s13 + $0x30] sm:$0xff]  ;;  %v723_v2 = vld [vmem:[%s2097_s13 + $0x38] sm:$0xff] }
 0x207   : > { %915 = vmatpush1.bf16.msra.mxu0 %v1497_v3  ;;  %1332 = vmatpush1.bf16.msra.mxu1 %v1497_v3  ;;  %v787_v37 = vmax.f32 %v771_v26, 0.0  ;;  %v765_v41 = vadd.f32 %v2107_v18, %v742_v35  ;;  %v772_v42 = vadd.f32 %v2107_v18, %v749_v23  ;;  %v773_v45 = vadd.f32 %v2107_v18, %v750_v38  ;;  %v730_v3 = vld [vmem:[%s2097_s13 + $0x70] sm:$0xff] }
 0x208   : > { %916 = vmatprep.subr.bf16.mxu0 %v1498_v4  ;;  %1325 = vmatprep.subr.bf16.mxu1 %v1498_v4  ;;  %v794_v43 = vpack.c.bf16 %v779_v36, %v778_v33  ;;  %v780_v50 = vmax.f32 %v764_v40, 0.0  ;;  %v743_v53 = vmul.f32 %v2100_v10, %v720_v46  ;;  %v744_v55 = vmul.f32 %v2100_v10, %v721_v47  ;;  %v731_v4 = vld [vmem:[%s2097_s13 + $0x78] sm:$0xff] }
 0x209   : > { %v798_v44 = vpack.c.bf16 %v787_v37, %v786_v30  ;;  %v781_v51 = vmax.f32 %v765_v41, 0.0  ;;  %v788_v52 = vmax.f32 %v772_v42, 0.0  ;;  %v789_v54 = vmax.f32 %v773_v45, 0.0 }
 0x20a   : > { %v751_v56 = vmul.f32 %v2100_v10, %v728_v48  ;;  %v752_v57 = vmul.f32 %v2100_v10, %v729_v49  ;;  %v766_v59 = vadd.f32 %v2107_v18, %v743_v53  ;;  %v767_v61 = vadd.f32 %v2107_v18, %v744_v55 }
 0x20b   : > { %917 = vmatpush1.bf16.msra.mxu0 %v1500_v5  ;;  %1333 = vmatpush1.bf16.msra.mxu1 %v1500_v5  ;;  %v795_v58 = vpack.c.bf16 %v781_v51, %v780_v50  ;;  %v799_v60 = vpack.c.bf16 %v789_v54, %v788_v52  ;;  %v753_v9 = vmul.f32 %v2100_v10, %v730_v3  ;;  %v820_v28 = vlaneseq }
 0x20c   : > { %918 = vmatprep.subr.bf16.mxu0 %v1501_v6  ;;  %1326 = vmatprep.subr.bf16.mxu1 %v1501_v6  ;;  %v774_v62 = vadd.f32 %v2107_v18, %v751_v56  ;;  %v775_v0 = vadd.f32 %v2107_v18, %v752_v57  ;;  %v782_v5 = vmax.f32 %v766_v59, 0.0  ;;  %v745_v6 = vmul.f32 %v2100_v10, %v722_v1 }
 0x20d   : > { %v783_v11 = vmax.f32 %v767_v61, 0.0  ;;  %v821_v12 = vshrl.u32 %v820_v28, 7 }
 0x20e   : > { %v790_v13 = vmax.f32 %v774_v62, 0.0  ;;  %v791_v14 = vmax.f32 %v775_v0, 0.0  ;;  %v768_v16 = vadd.f32 %v2107_v18, %v745_v6 }
 0x20f   : > { %919 = vmatpush1.bf16.msra.mxu0 %v1503_v8  ;;  %1334 = vmatpush1.bf16.msra.mxu1 %v1503_v8  ;;  %v746_v8 = vmul.f32 %v2100_v10, %v723_v2  ;;  %v796_v19 = vpack.c.bf16 %v783_v11, %v782_v5  ;;  %v826_v31 = vsub.s32 1, %v821_v12 }
 0x210   : > { %920 = vmatprep.subr.bf16.mxu0 %v1504_v15  ;;  %1327 = vmatprep.subr.bf16.mxu1 %v1504_v15  ;;  %v754_v15 = vmul.f32 %v2100_v10, %v731_v4  ;;  %v800_v20 = vpack.c.bf16 %v791_v14, %v790_v13  ;;  %v784_v7 = vmax.f32 %v768_v16, 0.0 }
 0x211   : > { %v769_v17 = vadd.f32 %v2107_v18, %v746_v8 }
 0x213   : > { %921 = vmatpush1.bf16.msra.mxu0 %v1506_v21  ;;  %1335 = vmatpush1.bf16.msra.mxu1 %v1506_v21  ;;  %v776_v21 = vadd.f32 %v2107_v18, %v753_v9  ;;  %v785_v24 = vmax.f32 %v769_v17, 0.0 }
 0x214   : > { %922 = vmatprep.subr.bf16.mxu0 %v1507_v22  ;;  %1328 = vmatprep.subr.bf16.mxu1 %v1507_v22  ;;  %v777_v22 = vadd.f32 %v2107_v18, %v754_v15  ;;  %v818_v18 = vld [vmem:[%s2347_s17] sm:$0x3] }
 0x215   : > { %v792_v25 = vmax.f32 %v776_v21, 0.0  ;;  %v797_v26 = vpack.c.bf16 %v785_v24, %v784_v7  ;;  %v2162_v33 = vrot.slane %v818_v18, %v826_v31 }
 0x216   : > { %v793_v10 = vmax.f32 %v777_v22, 0.0 }
 0x217   : > { %923 = vmatpush1.bf16.msra.mxu0 %v1509_v29  ;;  %1336 = vmatpush1.bf16.msra.mxu1 %v1509_v29  ;;  %v822_v29 = vsub.s32 0, %v821_v12 }
 0x218   : > { %924 = vmatprep.subr.bf16.mxu0 %v1510_v32  ;;  %1329 = vmatprep.subr.bf16.mxu1 %v1510_v32  ;;  %v801_v27 = vpack.c.bf16 %v793_v10, %v792_v25 }
 0x219   : > { %v2160_v32 = vrot.slane %v818_v18, %v822_v29 }
 0x21b   : > { %925 = vmatpush1.bf16.msra.mxu0 %v1512_v39  ;;  %1337 = vmatpush1.bf16.msra.mxu1 %v1512_v39 }
 0x21e   : > { %943 = vmatmul.mubr.bf16.vlgmr.msra.gmra.mrb[0].mxu0 %v794_v43  ;;  %983 = vmatmul.mubr.bf16.vlgmr.msra.gmra.mrb[0].mxu1 %v798_v44 }
 0x21f   : > { %952 = vmatprep.mubr.bf16.mxu0 %v1737_v63  ;;  %992 = vmatprep.mubr.bf16.mxu1 %v1737_v63 }
 0x226   : > { %953 = vmatmul.mubr.bf16.gmra.mrb[4].mxu0 %v795_v58  ;;  %993 = vmatmul.mubr.bf16.gmra.mrb[4].mxu1 %v799_v60 }
 0x227   : > { %962 = vmatprep.mubr.bf16.mxu0 %v1737_v63  ;;  %1002 = vmatprep.mubr.bf16.mxu1 %v1737_v63 }
 0x22e   : > { %963 = vmatmul.mubr.bf16.gmra.mrb[8].mxu0 %v796_v19  ;;  %1003 = vmatmul.mubr.bf16.gmra.mrb[8].mxu1 %v800_v20 }
 0x22f   : > { %972 = vmatprep.mubr.bf16.mxu0 %v1737_v63  ;;  %1012 = vmatprep.mubr.bf16.mxu1 %v1737_v63 }
 0x236   : > { %973 = vmatmul.mubr.bf16.gmra.mrb[12].mxu0 %v797_v26  ;;  %1013 = vmatmul.mubr.bf16.gmra.mrb[12].mxu1 %v801_v27 }
 0x2f1   : > { %v944_v34 = vpop.f32.mrb[0].mxu0  ;;  %v984_v63 = vpop.f32.mrb[0].mxu1 }
 0x2f2   : > { %v945_v35 = vadd.f32 %v944_v34, %v2160_v32  ;;  %v985_v23 = vadd.f32 %v984_v63, %v2160_v32  ;;  %v946_v36 = vpop.f32.mrb[1].mxu0  ;;  %v986_v30 = vpop.f32.mrb[1].mxu1 }
 0x2f3   : > { %v947_v37 = vadd.f32 %v946_v36, %v2162_v33  ;;  %v987_v38 = vadd.f32 %v986_v30, %v2162_v33  ;;  %v948_v39 = vpop.f32.mrb[2].mxu0  ;;  %v988_v40 = vpop.f32.mrb[2].mxu1 }
 0x2f4   : > { %1023 = vst [vmem:[%s2011_s1] sm:$0xff] %v945_v35  ;;  %1039 = vst [vmem:[%s2011_s1 + $0x80] sm:$0xff] %v985_v23  ;;  %v949_v41 = vadd.f32 %v948_v39, %v2160_v32  ;;  %v989_v42 = vadd.f32 %v988_v40, %v2160_v32  ;;  %v950_v43 = vpop.f32.mrb[3].mxu0  ;;  %v990_v44 = vpop.f32.mrb[3].mxu1 }
 0x2f5   : > { %1024 = vst [vmem:[%s2011_s1 + $0x8] sm:$0xff] %v947_v37  ;;  %1040 = vst [vmem:[%s2011_s1 + $0x88] sm:$0xff] %v987_v38  ;;  %v951_v45 = vadd.f32 %v950_v43, %v2162_v33  ;;  %v991_v46 = vadd.f32 %v990_v44, %v2162_v33 }
 0x2f6   : > { %1025 = vst [vmem:[%s2011_s1 + $0x10] sm:$0xff] %v949_v41  ;;  %1041 = vst [vmem:[%s2011_s1 + $0x90] sm:$0xff] %v989_v42 }
 0x2f7   : > { %1026 = vst [vmem:[%s2011_s1 + $0x18] sm:$0xff] %v951_v45  ;;  %1042 = vst [vmem:[%s2011_s1 + $0x98] sm:$0xff] %v991_v46 }
 0x2f9   : > { %v954_v47 = vpop.f32.mrb[4].mxu0  ;;  %v994_v48 = vpop.f32.mrb[4].mxu1 }
 0x2fa   : > { %v955_v49 = vadd.f32 %v954_v47, %v2160_v32  ;;  %v995_v50 = vadd.f32 %v994_v48, %v2160_v32  ;;  %v956_v51 = vpop.f32.mrb[5].mxu0  ;;  %v996_v52 = vpop.f32.mrb[5].mxu1 }
 0x2fb   : > { %v957_v53 = vadd.f32 %v956_v51, %v2162_v33  ;;  %v997_v54 = vadd.f32 %v996_v52, %v2162_v33  ;;  %v958_v55 = vpop.f32.mrb[6].mxu0  ;;  %v998_v56 = vpop.f32.mrb[6].mxu1 }
 0x2fc   : > { %1027 = vst [vmem:[%s2011_s1 + $0x20] sm:$0xff] %v955_v49  ;;  %1043 = vst [vmem:[%s2011_s1 + $0xa0] sm:$0xff] %v995_v50  ;;  %v959_v57 = vadd.f32 %v958_v55, %v2160_v32  ;;  %v999_v58 = vadd.f32 %v998_v56, %v2160_v32  ;;  %v960_v59 = vpop.f32.mrb[7].mxu0  ;;  %v1000_v60 = vpop.f32.mrb[7].mxu1 }
 0x2fd   : > { %1028 = vst [vmem:[%s2011_s1 + $0x28] sm:$0xff] %v957_v53  ;;  %1044 = vst [vmem:[%s2011_s1 + $0xa8] sm:$0xff] %v997_v54  ;;  %v961_v61 = vadd.f32 %v960_v59, %v2162_v33  ;;  %v1001_v62 = vadd.f32 %v1000_v60, %v2162_v33 }
 0x2fe   : > { %1029 = vst [vmem:[%s2011_s1 + $0x30] sm:$0xff] %v959_v57  ;;  %1045 = vst [vmem:[%s2011_s1 + $0xb0] sm:$0xff] %v999_v58 }
 0x2ff   : > { %1030 = vst [vmem:[%s2011_s1 + $0x38] sm:$0xff] %v961_v61  ;;  %1046 = vst [vmem:[%s2011_s1 + $0xb8] sm:$0xff] %v1001_v62 }
 0x301   : > { %v964_v0 = vpop.f32.mrb[8].mxu0  ;;  %v1004_v1 = vpop.f32.mrb[8].mxu1 }
 0x302   : > { %v965_v2 = vadd.f32 %v964_v0, %v2160_v32  ;;  %v1005_v3 = vadd.f32 %v1004_v1, %v2160_v32  ;;  %v966_v4 = vpop.f32.mrb[9].mxu0  ;;  %v1006_v5 = vpop.f32.mrb[9].mxu1 }
 0x303   : > { %v967_v6 = vadd.f32 %v966_v4, %v2162_v33  ;;  %v1007_v8 = vadd.f32 %v1006_v5, %v2162_v33  ;;  %v968_v9 = vpop.f32.mrb[10].mxu0  ;;  %v1008_v11 = vpop.f32.mrb[10].mxu1 }
 0x304   : > { %1031 = vst [vmem:[%s2011_s1 + $0x40] sm:$0xff] %v965_v2  ;;  %1047 = vst [vmem:[%s2011_s1 + $0xc0] sm:$0xff] %v1005_v3  ;;  %v969_v13 = vadd.f32 %v968_v9, %v2160_v32  ;;  %v1009_v14 = vadd.f32 %v1008_v11, %v2160_v32  ;;  %v970_v15 = vpop.f32.mrb[11].mxu0  ;;  %v1010_v16 = vpop.f32.mrb[11].mxu1 }
 0x305   : > { %1032 = vst [vmem:[%s2011_s1 + $0x48] sm:$0xff] %v967_v6  ;;  %1048 = vst [vmem:[%s2011_s1 + $0xc8] sm:$0xff] %v1007_v8  ;;  %v971_v17 = vadd.f32 %v970_v15, %v2162_v33  ;;  %v1011_v19 = vadd.f32 %v1010_v16, %v2162_v33 }
 0x306   : > { %1033 = vst [vmem:[%s2011_s1 + $0x50] sm:$0xff] %v969_v13  ;;  %1049 = vst [vmem:[%s2011_s1 + $0xd0] sm:$0xff] %v1009_v14 }
 0x307   : > { %1034 = vst [vmem:[%s2011_s1 + $0x58] sm:$0xff] %v971_v17  ;;  %1050 = vst [vmem:[%s2011_s1 + $0xd8] sm:$0xff] %v1011_v19 }
 0x309   : > { %v974_v20 = vpop.f32.mrb[12].mxu0  ;;  %v1014_v21 = vpop.f32.mrb[12].mxu1 }
 0x30a   : > { %v975_v22 = vadd.f32 %v974_v20, %v2160_v32  ;;  %v1015_v7 = vadd.f32 %v1014_v21, %v2160_v32  ;;  %v976_v24 = vpop.f32.mrb[13].mxu0  ;;  %v1016_v25 = vpop.f32.mrb[13].mxu1 }
 0x30b   : > { %v977_v10 = vadd.f32 %v976_v24, %v2162_v33  ;;  %v1017_v26 = vadd.f32 %v1016_v25, %v2162_v33  ;;  %v978_v27 = vpop.f32.mrb[14].mxu0  ;;  %v1018_v28 = vpop.f32.mrb[14].mxu1 }
 0x30c   : > { %1035 = vst [vmem:[%s2011_s1 + $0x60] sm:$0xff] %v975_v22  ;;  %1051 = vst [vmem:[%s2011_s1 + $0xe0] sm:$0xff] %v1015_v7  ;;  %v979_v12 = vadd.f32 %v978_v27, %v2160_v32  ;;  %v1019_v29 = vadd.f32 %v1018_v28, %v2160_v32  ;;  %v980_v18 = vpop.f32.mrb[15].mxu0  ;;  %v1020_v31 = vpop.f32.mrb[15].mxu1 }
 0x30d   : > { %1036 = vst [vmem:[%s2011_s1 + $0x68] sm:$0xff] %v977_v10  ;;  %1052 = vst [vmem:[%s2011_s1 + $0xe8] sm:$0xff] %v1017_v26  ;;  %v981_v34 = vadd.f32 %v980_v18, %v2162_v33  ;;  %v1021_v63 = vadd.f32 %v1020_v31, %v2162_v33 }
 0x30e   : > { %1037 = vst [vmem:[%s2011_s1 + $0x70] sm:$0xff] %v979_v12  ;;  %1053 = vst [vmem:[%s2011_s1 + $0xf0] sm:$0xff] %v1019_v29 }
 0x30f   : > { %1038 = vst [vmem:[%s2011_s1 + $0x78] sm:$0xff] %v981_v34  ;;  %1054 = vst [vmem:[%s2011_s1 + $0xf8] sm:$0xff] %v1021_v63 }
 0x310 PF: > { %s2348_s3 = sld [smem:[#allocation20_spill]]  ;;  %s1063_s29 = smul.u32 %s1709_s27, %s1713_s28 }
 0x311   : > { %s1071_s9 = sshll.u32 %s2011_s1, 4  ;;  %s2349_s10 = sld [smem:[#allocation27_spill]]  ;;  %s2231_s9 = int_to_ptr.vmem [resolvable:$true] %s1071_s9 }
 0x312   : > { %s1241_s20 = sshll.u32 %s1063_s29, 12  ;;  %s2240_s8 = scalar_lea.sflag [#allocation9], %s317_s2 }
 0x313   : > { %s1599_s19 = scalar_lea.vmem %s2231_s9, 4096  ;;  %s1738_s27 = smov [#allocation13]  }
 0x314   : > { %p1600_p7 = scmp.ne.s32.totalorder %s2231_s9, %s1599_s19  ;;  %s1603_s28 = sshll.u32 %s1738_s27, 4  ;;  %s1604_s28 = int_to_ptr.vmem [resolvable:$false] %s1603_s28 }
 0x315   : > { %s1605_s1 = scalar_lea.vmem %s1604_s28, 8192  ;;  %p1606_p8 = scmp.lt.s32.totalorder %s2231_s9, %s1604_s28 }
 0x316   : > { %p2350_p9 = scmp.ne.s32.totalorder %s2348_s3, 0  ;;  %p1607_p12 = scmp.lt.s32.totalorder %s1605_s1, %s1599_s19 }
 0x317   : > { %s2236_s12 = scalar_lea.hbm %s2349_s10, %s1241_s20 }
 0x318   : > { %p1601_p11 = pnand %p1600_p7, %p2350_p9  ;;  %p1608_p2 = por %p1607_p12, %p1606_p8 }
 0x31a   : > { %p1602_p5 = pneg %p1601_p11 }
 0x31c   : > { %p1609_p6 = pnand %p1608_p2, %p1602_p5 }
 0x31e   : > { %1612 = shalt.err (!%p1609_p6)
}
 0x31f   : > { %s1613_s2 = scalar_lea.hbm %s2236_s12, 4096  ;;  %s1617_s6 = scalar_lea.hbm %s2349_s10, 8192 }
 0x320   : > { %p1614_p10 = scmp.ne.s32.totalorder %s2236_s12, %s1613_s2  ;;  %p1618_p1 = scmp.lt.u32.totalorder %s2236_s12, %s2349_s10 }
 0x321   : > { %p1619_p3 = scmp.lt.u32.totalorder %s1617_s6, %s1613_s2  ;;  %p1621_p7 = scmp.lt.u32.totalorder %s1613_s2, %s2236_s12 }
 0x322   : > { %p1615_p0 = pnand %p1614_p10, %p2350_p9 }
 0x323   : > { %p1620_p13 = por %p1619_p3, %p1618_p1 }
 0x324   : > { %p1616_p4 = pneg %p1615_p0 }
 0x325   : > { %p1622_p11 = por %p1621_p7, %p1620_p13 }
 0x327   : > { %p1623_p5 = pnand %p1622_p11, %p1616_p4 }
 0x329   : > { %1626 = shalt.err (!%p1623_p5)
}
 0x32a   : > { %s1739_s14 = smov 256   ;;  %s1740_s17 = smov 16  }
 0x32b   : > { %1348 = dma.vmem_to_hbm [thread:$0]  (%p2350_p9), %s2231_s9, 4096, %s2236_s12, %s2240_s8, %s1739_s14, %s1739_s14, %s1740_s17  }
 0x32c PF: > { %s2351_s29 = sld [smem:[#allocation17_spill]]  ;;  %s2352_s20 = sld [smem:[#allocation21_spill]] }
 0x32d   : > { %p1370_p8 = scmp.ge.s32.totalorder %s1725_s7, 2 }
 0x332   : > { %s1086_s15 = sand.u32 1, %s2351_s29   ;;  %p2353_p12 = scmp.ne.s32.totalorder %s2352_s20, 0 }
 0x333   : > { %s1087_s18 = scalar_lea.sflag [#allocation9], %s1086_s15 }
 0x334   : > { %p1362_p2 = pnand %p1370_p8, %p2353_p12 }
 0x336   : > { %1680 = dma.done.wait (!%p1362_p2), %s1087_s18, 4096  }
 0x337   : > { %1682 = vsyncadd (!%p1362_p2), %s1087_s18, 4294963200  ;;  %s23_s7 = sadd.s32 1, %s1725_s7   ;;  %s2354_s27 = sld [smem:[#allocation18_spill]] }
 0x338   : > { %p20_p6 = scmp.ge.s32.totalorder %s23_s7, 6   ;;  %s2355_s28 = sld [smem:[#allocation19_spill]] }
 0x339   : > { %s2356_s3 = smov %s2367_s24  ;;  %s2357_s9 = smov %s2371_s21 }
 0x33a   : > { %s2358_s21 = smov %s1689_s22  ;;  %s2359_s22 = smov %s1693_s23 }
 0x33b   : > { %s2360_s23 = smov %s1946_s4  ;;  %s2361_s24 = smov %s1701_s25 }
 0x33c   : > { %s2362_s25 = smov %s1705_s26  ;;  %s2363_s26 = smov %s1949_s30 }
 0x33d   : > { %s2364_s29 = smov %s2356_s3  ;;  %s2365_s30 = smov %s2357_s9 }
 0x33e   :  { %22 = sbr.rel (!%p20_p6) target bundleno = 17 (0x11), region = 115 }
 0x345   :  { %1092 = vsyncpa [#allocation8], 1 }
 0x346   :  { %1094 = vsyncpa [#allocation8 + $0x1], 1 }
 0x347   :  { %1095 = vsyncpa [#allocation11], 1 }
 0x348   :  { %1096 = vsyncpa [#allocation9], 1 }
 0x349   :  { %1098 = vsyncpa [#allocation9 + $0x1], 1 }

</bundles_post_ra>
